<compile_context>
chip_gen: v7x
topology: tpu7x:2x2x1
jax: 0.10.0
libtpu: 0.0.40
codegen_flags: <defaults>
</compile_context>

<pallas_src>
import jax
import jax.numpy as jnp
from jax.experimental import pallas as pl
from jax.experimental.pallas import tpu as pltpu

INPUT_SIZE = 768
HIDDEN = 256
HIDDEN2 = HIDDEN // 2      # 128
NUM_EMOTIONS = 4
OUT_PAD = 128              # lane-dense padded logits width (multiple of 128)


def emotion_mlp_kernel(x_ref, w1_ref, b1_ref, w2_ref, b2_ref, w3_ref, b3_ref, o_ref):
    # Cast activations to bf16 in VMEM (x arrives in its native dtype; no extra HBM pass).
    x = x_ref[...].astype(jnp.bfloat16)
    # fc1 + ReLU  (bf16 operands on MXU, f32 accumulate; bias add / ReLU in f32 on VPU)
    h1 = jnp.dot(x, w1_ref[...], preferred_element_type=jnp.float32) + b1_ref[...]
    h1 = jnp.maximum(h1, 0.0)
    # dropout (eval) = identity
    # fc2 + ReLU
    h2 = jnp.dot(h1.astype(jnp.bfloat16), w2_ref[...],
                 preferred_element_type=jnp.float32) + b2_ref[...]
    h2 = jnp.maximum(h2, 0.0)
    # dropout (eval) = identity
    # fc3 (logits) -> lane-dense (TB, 128) bf16 store; columns >= NUM_EMOTIONS are zeros.
    logits = jnp.dot(h2.astype(jnp.bfloat16), w3_ref[...],
                     preferred_element_type=jnp.float32) + b3_ref[...]
    o_ref[...] = logits.astype(o_ref.dtype)


def _round_up(n, m):
    return ((n + m - 1) // m) * m


def prepare_params(params):
    """Convert f32 (in, out) params to kernel layout:
    bf16 weights, f32 biases, fc3 zero-padded to OUT_PAD output columns."""
    w1, b1, w2, b2, w3, b3 = params
    w3p = jnp.zeros((HIDDEN2, OUT_PAD), jnp.float32).at[:, :NUM_EMOTIONS].set(w3)
    b3p = jnp.zeros((1, OUT_PAD), jnp.float32).at[:, :NUM_EMOTIONS].set(b3)
    return (w1.astype(jnp.bfloat16), b1.astype(jnp.float32),
            w2.astype(jnp.bfloat16), b2.astype(jnp.float32),
            w3p.astype(jnp.bfloat16), b3p.astype(jnp.float32))


def emotion_model_forward(x, kernel_params):
    """x: (B, 768) float array (any float dtype). kernel_params from prepare_params().
    Returns (B, 4) f32 logits."""
    w1, b1, w2, b2, w3, b3 = kernel_params
    B = x.shape[0]
    if B == 0:
        return jnp.zeros((0, NUM_EMOTIONS), jnp.float32)

    # Batch tile: multiple of 16 (bf16 output sublane packing), aim for >= 2 grid steps
    # so v7x megacore can shard the 'parallel' axis, cap at 1024 to bound VMEM.
    TB = min(1024, _round_up(max(pl.cdiv(B, 2), 1), 16))
    grid = (pl.cdiv(B, TB),)

    flops = 2 * B * (INPUT_SIZE * HIDDEN + HIDDEN * HIDDEN2 + HIDDEN2 * OUT_PAD)
    bytes_accessed = (
        B * INPUT_SIZE * x.dtype.itemsize            # x in native dtype
        + (w1.size + w2.size + w3.size) * 2          # weights (bf16), VMEM-resident once
        + (b1.size + b2.size + b3.size) * 4          # biases (f32)
        + B * OUT_PAD * 2                            # output (bf16)
    )

    out = pl.pallas_call(
        emotion_mlp_kernel,
        out_shape=jax.ShapeDtypeStruct((B, OUT_PAD), jnp.bfloat16),
        grid=grid,
        in_specs=[
            pl.BlockSpec((TB, INPUT_SIZE), lambda i: (i, 0)),      # x: tiled over batch
            pl.BlockSpec((INPUT_SIZE, HIDDEN), lambda i: (0, 0)),  # w1: VMEM-resident
            pl.BlockSpec((1, HIDDEN), lambda i: (0, 0)),           # b1
            pl.BlockSpec((HIDDEN, HIDDEN2), lambda i: (0, 0)),     # w2
            pl.BlockSpec((1, HIDDEN2), lambda i: (0, 0)),          # b2
            pl.BlockSpec((HIDDEN2, OUT_PAD), lambda i: (0, 0)),    # w3 (padded)
            pl.BlockSpec((1, OUT_PAD), lambda i: (0, 0)),          # b3 (padded)
        ],
        out_specs=pl.BlockSpec((TB, OUT_PAD), lambda i: (i, 0)),
        compiler_params=pltpu.CompilerParams(
            dimension_semantics=("parallel",),
        ),
        cost_estimate=pl.CostEstimate(
            flops=flops, transcendentals=0, bytes_accessed=bytes_accessed),
    )(x, w1, b1, w2, b2, w3, b3)

    # Strip only the lane padding of the logits (tiny read); keep accumulator-style f32 out.
    return out[:, :NUM_EMOTIONS].astype(jnp.float32)


def init_params(key):
    """Deterministic init matching PyTorch Linear shapes (stored as (in, out)), f32."""
    k1, k2, k3, k4, k5, k6 = jax.random.split(key, 6)

    def uniform(k, shape, fan_in):
        bound = 1.0 / jnp.sqrt(fan_in)
        return jax.random.uniform(k, shape, jnp.float32, -bound, bound)

    w1 = uniform(k1, (INPUT_SIZE, HIDDEN), INPUT_SIZE)
    b1 = uniform(k2, (1, HIDDEN), INPUT_SIZE)
    w2 = uniform(k3, (HIDDEN, HIDDEN2), HIDDEN)
    b2 = uniform(k4, (1, HIDDEN2), HIDDEN)
    w3 = uniform(k5, (HIDDEN2, NUM_EMOTIONS), HIDDEN2)
    b3 = uniform(k6, (1, NUM_EMOTIONS), HIDDEN2)
    return (w1, b1, w2, b2, w3, b3)


def reference_forward_bf16(x, params):
    """Reference mirroring the kernel's dtype policy (bf16 operands/output, f32 accumulate)."""
    w1, b1, w2, b2, w3, b3 = params
    bf = jnp.bfloat16
    h1 = jnp.maximum(
        jnp.dot(x.astype(bf), w1.astype(bf), preferred_element_type=jnp.float32) + b1, 0.0)
    h2 = jnp.maximum(
        jnp.dot(h1.astype(bf), w2.astype(bf), preferred_element_type=jnp.float32) + b2, 0.0)
    logits = jnp.dot(h2.astype(bf), w3.astype(bf), preferred_element_type=jnp.float32) + b3
    return logits.astype(bf).astype(jnp.float32)


def reference_forward_f32(x, params):
    """Pure f32 PyTorch-equivalent reference (eval mode: dropout = identity)."""
    w1, b1, w2, b2, w3, b3 = params
    h1 = jnp.maximum(x @ w1 + b1, 0.0)
    h2 = jnp.maximum(h1 @ w2 + b2, 0.0)
    return h2 @ w3 + b3


if __name__ == "__main__":
    key = jax.random.PRNGKey(0)
    kx, kx2, kp = jax.random.split(key, 3)

    params = init_params(kp)
    kparams = prepare_params(params)

    # Small canonical batch.
    B = 2
    x = jax.random.normal(kx, (B, INPUT_SIZE), dtype=jnp.float32)
    out = jax.block_until_ready(emotion_model_forward(x, kparams))
    assert out.shape == (B, NUM_EMOTIONS), out.shape

    ref_bf16 = reference_forward_bf16(x, params)
    assert jnp.allclose(out, ref_bf16, atol=2e-2, rtol=2e-2), "mismatch vs bf16-matched reference"
    ref_f32 = reference_forward_f32(x, params)
    assert jnp.allclose(out, ref_f32, atol=6e-2, rtol=6e-2), "mismatch vs f32 reference"

    # Ragged batch to exercise the cdiv grid / partial last block (no physical pad).
    B2 = 37
    x2 = jax.random.normal(kx2, (B2, INPUT_SIZE), dtype=jnp.float32)
    out2 = jax.block_until_ready(emotion_model_forward(x2, kparams))
    assert out2.shape == (B2, NUM_EMOTIONS), out2.shape
    ref2 = reference_forward_bf16(x2, params)
    assert jnp.allclose(out2, ref2, atol=2e-2, rtol=2e-2), "mismatch on ragged batch"

    print("KERNEL_OK")
</pallas_src>

<mosaic_0001>
module attributes {stable_mosaic.version = 11 : i64} {
  func.func @emotion_mlp_kernel(%arg0: i32, %arg1: memref<16x768xf32, #tpu.memory_space<vmem>>, %arg2: memref<768x256xbf16, #tpu.memory_space<vmem>>, %arg3: memref<1x256xf32, #tpu.memory_space<vmem>>, %arg4: memref<256x128xbf16, #tpu.memory_space<vmem>>, %arg5: memref<1x128xf32, #tpu.memory_space<vmem>>, %arg6: memref<128x128xbf16, #tpu.memory_space<vmem>>, %arg7: memref<1x128xf32, #tpu.memory_space<vmem>>, %arg8: memref<16x128xbf16, #tpu.memory_space<vmem>>) attributes {dimension_semantics = [#tpu.dimension_semantics<parallel>], iteration_bounds = array<i64: 1>, scalar_prefetch = 0 : i64, scratch_operands = 0 : i64, tpu.core_type = #tpu.core_type<tc>, window_params = [{transform_indices = @transform_0, window_bounds = array<i64: 16, 768>}, {pipeline_mode = #tpu.pipeline_mode<synchronous>, transform_indices = @transform_1, window_bounds = array<i64: 768, 256>}, {pipeline_mode = #tpu.pipeline_mode<synchronous>, transform_indices = @transform_2, window_bounds = array<i64: 1, 256>}, {pipeline_mode = #tpu.pipeline_mode<synchronous>, transform_indices = @transform_3, window_bounds = array<i64: 256, 128>}, {pipeline_mode = #tpu.pipeline_mode<synchronous>, transform_indices = @transform_4, window_bounds = array<i64: 1, 128>}, {pipeline_mode = #tpu.pipeline_mode<synchronous>, transform_indices = @transform_5, window_bounds = array<i64: 128, 128>}, {pipeline_mode = #tpu.pipeline_mode<synchronous>, transform_indices = @transform_6, window_bounds = array<i64: 1, 128>}, {transform_indices = @transform_7, window_bounds = array<i64: 16, 128>}]} {
    %c0 = arith.constant 0 : index
    %c0_0 = arith.constant 0 : index
    %0 = vector.load %arg1[%c0, %c0_0] : memref<16x768xf32, #tpu.memory_space<vmem>>, vector<16x768xf32>
    %1 = arith.truncf %0 : vector<16x768xf32> to vector<16x768xbf16>
    %c0_1 = arith.constant 0 : index
    %c0_2 = arith.constant 0 : index
    %2 = vector.load %arg2[%c0_1, %c0_2] : memref<768x256xbf16, #tpu.memory_space<vmem>>, vector<768x256xbf16>
    %cst = arith.constant dense<0.000000e+00> : vector<16x256xf32>
    %3 = tpu.matmul %1, %2, %cst {dimension_numbers = #tpu.dot_dimension_numbers<[1], [0], [0], [1], [0, 0, 1, 1], [], []>} : vector<16x768xbf16>, vector<768x256xbf16>, vector<16x256xf32> -> vector<16x256xf32>
    %c0_3 = arith.constant 0 : index
    %c0_4 = arith.constant 0 : index
    %4 = vector.load %arg3[%c0_3, %c0_4] : memref<1x256xf32, #tpu.memory_space<vmem>>, vector<1x256xf32>
    %5 = vector.broadcast %4 : vector<1x256xf32> to vector<16x256xf32>
    %6 = arith.addf %3, %5 : vector<16x256xf32>
    %cst_5 = arith.constant 0.000000e+00 : f32
    %7 = vector.broadcast %cst_5 : f32 to vector<16x256xf32>
    %8 = arith.maximumf %6, %7 : vector<16x256xf32>
    %9 = arith.truncf %8 : vector<16x256xf32> to vector<16x256xbf16>
    %c0_6 = arith.constant 0 : index
    %c0_7 = arith.constant 0 : index
    %10 = vector.load %arg4[%c0_6, %c0_7] : memref<256x128xbf16, #tpu.memory_space<vmem>>, vector<256x128xbf16>
    %cst_8 = arith.constant dense<0.000000e+00> : vector<16x128xf32>
    %11 = tpu.matmul %9, %10, %cst_8 {dimension_numbers = #tpu.dot_dimension_numbers<[1], [0], [0], [1], [0, 0, 1, 1], [], []>} : vector<16x256xbf16>, vector<256x128xbf16>, vector<16x128xf32> -> vector<16x128xf32>
    %c0_9 = arith.constant 0 : index
    %c0_10 = arith.constant 0 : index
    %12 = vector.load %arg5[%c0_9, %c0_10] : memref<1x128xf32, #tpu.memory_space<vmem>>, vector<1x128xf32>
    %13 = vector.broadcast %12 : vector<1x128xf32> to vector<16x128xf32>
    %14 = arith.addf %11, %13 : vector<16x128xf32>
    %cst_11 = arith.constant 0.000000e+00 : f32
    %15 = vector.broadcast %cst_11 : f32 to vector<16x128xf32>
    %16 = arith.maximumf %14, %15 : vector<16x128xf32>
    %17 = arith.truncf %16 : vector<16x128xf32> to vector<16x128xbf16>
    %c0_12 = arith.constant 0 : index
    %c0_13 = arith.constant 0 : index
    %18 = vector.load %arg6[%c0_12, %c0_13] : memref<128x128xbf16, #tpu.memory_space<vmem>>, vector<128x128xbf16>
    %cst_14 = arith.constant dense<0.000000e+00> : vector<16x128xf32>
    %19 = tpu.matmul %17, %18, %cst_14 {dimension_numbers = #tpu.dot_dimension_numbers<[1], [0], [0], [1], [0, 0, 1, 1], [], []>} : vector<16x128xbf16>, vector<128x128xbf16>, vector<16x128xf32> -> vector<16x128xf32>
    %c0_15 = arith.constant 0 : index
    %c0_16 = arith.constant 0 : index
    %20 = vector.load %arg7[%c0_15, %c0_16] : memref<1x128xf32, #tpu.memory_space<vmem>>, vector<1x128xf32>
    %21 = vector.broadcast %20 : vector<1x128xf32> to vector<16x128xf32>
    %22 = arith.addf %19, %21 : vector<16x128xf32>
    %23 = arith.truncf %22 : vector<16x128xf32> to vector<16x128xbf16>
    %c0_17 = arith.constant 0 : index
    %c0_18 = arith.constant 0 : index
    %24 = vector.load %arg8[%c0_17, %c0_18] : memref<16x128xbf16, #tpu.memory_space<vmem>>, vector<16x128xbf16>
    tpu.vector_store %arg8[%c0_17, %c0_18], %23 {strides = array<i32>} : memref<16x128xbf16, #tpu.memory_space<vmem>>, vector<16x128xbf16>,
    return
  }
  func.func @transform_0(%arg0: i32) -> (i32, i32) {
    %c0_i32 = arith.constant 0 : i32
    %c0_i32_0 = arith.constant 0 : i32
    return %arg0, %c0_i32 : i32, i32
  }
  func.func @transform_1(%arg0: i32) -> (i32, i32) {
    %c0_i32 = arith.constant 0 : i32
    %c0_i32_0 = arith.constant 0 : i32
    %c0_i32_1 = arith.constant 0 : i32
    return %c0_i32, %c0_i32_0 : i32, i32
  }
  func.func @transform_2(%arg0: i32) -> (i32, i32) {
    %c0_i32 = arith.constant 0 : i32
    %c0_i32_0 = arith.constant 0 : i32
    %c0_i32_1 = arith.constant 0 : i32
    return %c0_i32, %c0_i32_0 : i32, i32
  }
  func.func @transform_3(%arg0: i32) -> (i32, i32) {
    %c0_i32 = arith.constant 0 : i32
    %c0_i32_0 = arith.constant 0 : i32
    %c0_i32_1 = arith.constant 0 : i32
    return %c0_i32, %c0_i32_0 : i32, i32
  }
  func.func @transform_4(%arg0: i32) -> (i32, i32) {
    %c0_i32 = arith.constant 0 : i32
    %c0_i32_0 = arith.constant 0 : i32
    %c0_i32_1 = arith.constant 0 : i32
    return %c0_i32, %c0_i32_0 : i32, i32
  }
  func.func @transform_5(%arg0: i32) -> (i32, i32) {
    %c0_i32 = arith.constant 0 : i32
    %c0_i32_0 = arith.constant 0 : i32
    %c0_i32_1 = arith.constant 0 : i32
    return %c0_i32, %c0_i32_0 : i32, i32
  }
  func.func @transform_6(%arg0: i32) -> (i32, i32) {
    %c0_i32 = arith.constant 0 : i32
    %c0_i32_0 = arith.constant 0 : i32
    %c0_i32_1 = arith.constant 0 : i32
    return %c0_i32, %c0_i32_0 : i32, i32
  }
  func.func @transform_7(%arg0: i32) -> (i32, i32) {
    %c0_i32 = arith.constant 0 : i32
    %c0_i32_0 = arith.constant 0 : i32
    return %arg0, %c0_i32 : i32, i32
  }
}

</mosaic_0001>

<bundles_post_ra>
// kernel: tpu_custom_call.1
= control target key start
LH: loop header
LB: loop body
LE: loop exit
PB: predicated region body
PF: predicated region fallthrough
CT: control target
= control target key end

     0   :  { %12 = vsyncpa [#allocation3], 0  ;;  %s2028_s0 = inlined_call_operand.hbm [shape: f32[2,768], index: 0, kind: input, shape index: {}]   ;;  %s2029_s1 = inlined_call_operand.hbm [shape: bf16[768,256], index: 1, kind: input, shape index: {}]   ;;  %s2030_s2 = inlined_call_operand.vmem [shape: f32[1,256], index: 2, kind: input, shape index: {}]   ;;  %s2031_s3 = inlined_call_operand.hbm [shape: bf16[256,128], index: 3, kind: input, shape index: {}]   ;;  %s2032_s4 = inlined_call_operand.vmem [shape: f32[1,128], index: 4, kind: input, shape index: {}]   ;;  %s2033_s5 = inlined_call_operand.hbm [shape: bf16[128,128], index: 5, kind: input, shape index: {}]   ;;  %s2034_s6 = inlined_call_operand.vmem [shape: f32[1,128], index: 6, kind: input, shape index: {}]   ;;  %s2035_s7 = inlined_call_operand.hbm [shape: bf16[2,128], index: 7, kind: output, shape index: {}]  }
   0x1   :  { %13 = vsyncpa [#allocation6], 0 }
   0x2   :  { %14 = vsyncpa [#allocation9], 0 }
   0x3   :  { %15 = vsyncpa [#allocation4], 0 }
   0x4   :  { %20 = vsyncadd [#allocation3], 1344  ;;  %s1850_s24 = smov [#allocation5]   ;;  %s1732_s28 = scalar_lea.hbm %s2029_s1, 12288 }
   0x5   :  { %s33_s25 = sshll.u32 %s1850_s24, 4  ;;  %p1733_p0 = scmp.ne.s32.totalorder %s2029_s1, %s1732_s28  ;;  %s34_s25 = int_to_ptr.vmem [resolvable:$true] %s33_s25 }
   0x6   :  { %p1736_p1 = scmp.lt.u32.totalorder %s1732_s28, %s2029_s1 }
   0x8   :  { %p1738_p2 = pnand %p1736_p1, %p1733_p0 }
   0xa   :  { %1741 = shalt.err (!%p1738_p2)
}
   0xb   :  { %s1742_s10 = scalar_lea.vmem %s34_s25, 12288  ;;  %p1747_p4 = scmp.lt.s32.totalorder %s34_s25, %s34_s25 }
   0xc   :  { %p1743_p3 = scmp.ne.s32.totalorder %s34_s25, %s1742_s10  ;;  %p1748_p5 = scmp.lt.s32.totalorder %s1742_s10, %s1742_s10 }
   0xe   :  { %p1749_p6 = por %p1748_p5, %p1747_p4 }
  0x10   :  { %p1750_p7 = pnand %p1749_p6, %p1743_p3 }
  0x12   :  { %1753 = shalt.err (!%p1750_p7)
}
  0x13   :  { %s1851_s11 = smov 128   ;;  %s1852_s12 = smov 8  }
  0x14   :  { %39 = dma.hbm_to_vmem [thread:$0]  %s2029_s1, 12288, %s34_s25, [#allocation6], %s1851_s11, %s1851_s11, %s1852_s12  }
  0x15   :  { %s1853_s15 = smov [#allocation2]   ;;  %s1754_s19 = scalar_lea.hbm %s2028_s0, 192 }
  0x16   :  { %s21_s16 = sshll.u32 %s1853_s15, 4  ;;  %p1755_p8 = scmp.ne.s32.totalorder %s2028_s0, %s1754_s19  ;;  %s22_s16 = int_to_ptr.vmem [resolvable:$true] %s21_s16 }
  0x17   :  { %p1758_p9 = scmp.lt.u32.totalorder %s1754_s19, %s2028_s0 }
  0x19   :  { %p1760_p10 = pnand %p1758_p9, %p1755_p8 }
  0x1b   :  { %1763 = shalt.err (!%p1760_p10)
}
  0x1c   :  { %s1764_s24 = scalar_lea.vmem %s22_s16, 192  ;;  %s1768_s1 = scalar_lea.vmem %s22_s16, 1536 }
  0x1d   :  { %p1765_p11 = scmp.ne.s32.totalorder %s22_s16, %s1764_s24  ;;  %p1769_p12 = scmp.lt.s32.totalorder %s22_s16, %s22_s16 }
  0x1e   :  { %p1770_p13 = scmp.lt.s32.totalorder %s1768_s1, %s1764_s24 }
  0x20   :  { %p1771_p0 = por %p1770_p13, %p1769_p12 }
  0x22   :  { %p1772_p1 = pnand %p1771_p0, %p1765_p11 }
  0x24   :  { %1775 = shalt.err (!%p1772_p1)
}
  0x25   :  { %s1854_s25 = smov 192   ;;  %s1855_s26 = smov 12  }
  0x26   :  { %27 = dma.hbm_to_vmem [thread:$0]  %s2028_s0, 192, %s22_s16, [#allocation3], %s1854_s25, %s1854_s25, %s1855_s26  }
  0x27   :  { %s1856_s29 = smov [#allocation7]   ;;  %s1776_s10 = scalar_lea.hbm %s2031_s3, 2048 }
  0x28   :  { %s47_s30 = sshll.u32 %s1856_s29, 4  ;;  %p1777_p2 = scmp.ne.s32.totalorder %s2031_s3, %s1776_s10  ;;  %s48_s30 = int_to_ptr.vmem [resolvable:$true] %s47_s30 }
  0x29   :  { %p1780_p3 = scmp.lt.u32.totalorder %s1776_s10, %s2031_s3 }
  0x2b   :  { %p1782_p4 = pnand %p1780_p3, %p1777_p2 }
  0x2d   :  { %1785 = shalt.err (!%p1782_p4)
}
  0x2e   :  { %s1786_s15 = scalar_lea.vmem %s48_s30, 2048  ;;  %p1791_p6 = scmp.lt.s32.totalorder %s48_s30, %s48_s30 }
  0x2f   :  { %p1787_p5 = scmp.ne.s32.totalorder %s48_s30, %s1786_s15  ;;  %p1792_p7 = scmp.lt.s32.totalorder %s1786_s15, %s1786_s15 }
  0x31   :  { %p1793_p8 = por %p1792_p7, %p1791_p6 }
  0x33   :  { %p1794_p9 = pnand %p1793_p8, %p1787_p5 }
  0x35   :  { %1797 = shalt.err (!%p1794_p9)
}
  0x36   :  { %s1857_s0 = smov 64   ;;  %s1858_s16 = smov 4  }
  0x37   :  { %53 = dma.hbm_to_vmem [thread:$0]  %s2031_s3, 2048, %s48_s30, [#allocation6], %s1857_s0, %s1857_s0, %s1858_s16  }
  0x38   :  { %s1859_s19 = smov [#allocation8]   ;;  %s1798_s23 = scalar_lea.hbm %s2033_s5, 1024 }
  0x39   :  { %s61_s20 = sshll.u32 %s1859_s19, 4  ;;  %p1799_p10 = scmp.ne.s32.totalorder %s2033_s5, %s1798_s23  ;;  %s62_s20 = int_to_ptr.vmem [resolvable:$true] %s61_s20 }
  0x3a   :  { %p1802_p11 = scmp.lt.u32.totalorder %s1798_s23, %s2033_s5 }
  0x3c   :  { %p1804_p12 = pnand %p1802_p11, %p1799_p10 }
  0x3e   :  { %1807 = shalt.err (!%p1804_p12)
}
  0x3f   :  { %s1808_s27 = scalar_lea.vmem %s62_s20, 1024  ;;  %p1813_p0 = scmp.lt.s32.totalorder %s62_s20, %s62_s20 }
  0x40   :  { %p1809_p13 = scmp.ne.s32.totalorder %s62_s20, %s1808_s27  ;;  %p1814_p1 = scmp.lt.s32.totalorder %s1808_s27, %s1808_s27 }
  0x42   :  { %p1815_p2 = por %p1814_p1, %p1813_p0 }
  0x44   :  { %p1816_p3 = pnand %p1815_p2, %p1809_p13 }
  0x46   :  { %1819 = shalt.err (!%p1816_p3)
}
  0x47   :  { %67 = dma.hbm_to_vmem [thread:$0]  %s2033_s5, 1024, %s62_s20, [#allocation9], %s1857_s0, %s1857_s0, %s1858_s16  }
  0x48   :  { %1842 = dma.done.wait [#allocation3], 1536  }
  0x49   :  { %1843 = vsyncadd [#allocation3], 4294965760 }
  0x4a   :  { %1844 = dma.done.wait [#allocation6], 14336  }
  0x4b   :  { %1845 = vsyncadd [#allocation6], 4294952960 }
  0x4c   :  { %1846 = dma.done.wait [#allocation9], 1024  }
  0x4d   :  { %1847 = vsyncadd [#allocation9], 4294966272  ;;  %v1548_v0 = vld [vmem:[#allocation5 + $0x104] ss:$8 sps:$4 sm:$0xff]   ;;  %v1550_v1 = vld [vmem:[#allocation5 + $0x100] ss:$8 sps:$4 sm:$0xff]   ;;  %v122_v13 = vlaneseq }
  0x4e   :  { %872 = vmatprep.subr.bf16.mxu0 %v1548_v0  ;;  %v1551_v2 = vld [vmem:[#allocation5 + $0x114] ss:$8 sps:$4 sm:$0xff]   ;;  %v1553_v3 = vld [vmem:[#allocation5 + $0x110] ss:$8 sps:$4 sm:$0xff]   ;;  %v1554_v4 = vld [vmem:[#allocation5 + $0x124] ss:$8 sps:$4 sm:$0xff]  }
  0x4f   :  { %873 = vmatpush1.bf16.msra.mxu0 %v1550_v1  ;;  %v1556_v5 = vld [vmem:[#allocation5 + $0x120] ss:$8 sps:$4 sm:$0xff]   ;;  %v1557_v6 = vld [vmem:[#allocation5 + $0x134] ss:$8 sps:$4 sm:$0xff]   ;;  %v1559_v7 = vld [vmem:[#allocation5 + $0x130] ss:$8 sps:$4 sm:$0xff]  }
  0x50   :  { %874 = vmatprep.subr.bf16.mxu0 %v1551_v2  ;;  %v1560_v8 = vld [vmem:[#allocation5 + $0x144] ss:$8 sps:$4 sm:$0xff]   ;;  %v1562_v9 = vld [vmem:[#allocation5 + $0x140] ss:$8 sps:$4 sm:$0xff]   ;;  %v1563_v10 = vld [vmem:[#allocation5 + $0x154] ss:$8 sps:$4 sm:$0xff]  }
  0x51   :  { %v1860_v11 = vmov 1983009808   ;;  %v1565_v14 = vld [vmem:[#allocation5 + $0x150] ss:$8 sps:$4 sm:$0xff]   ;;  %v1566_v15 = vld [vmem:[#allocation5 + $0x164] ss:$8 sps:$4 sm:$0xff]  }
  0x52   :  { %v120_v12 = vunpack.c.l.s4 %v1860_v11  ;;  %v1593_v16 = vld [vmem:[#allocation5 + $0x4] ss:$8 sps:$4 sm:$0xff]   ;;  %v1955_v18 = vshrl.u32 %v122_v13, 7  ;;  %v1595_v19 = vld [vmem:[#allocation5] ss:$8 sps:$4 sm:$0xff]   ;;  %vm1862_vm0 = vmmov 0  }
  0x53   :  { %875 = vmatpush1.bf16.msra.mxu0 %v1553_v3  ;;  %v1568_v20 = vld [vmem:[#allocation5 + $0x160] ss:$8 sps:$4 sm:$0xff]   ;;  %v1569_v21 = vld [vmem:[#allocation5 + $0x174] ss:$8 sps:$4 sm:$0xff]   ;;  %829 = vmatprep.subr.bf16.mxu1 %v1593_v16  ;;  %v1601_v23 = vld [vmem:[#allocation5 + $0x10] ss:$8 sps:$4 sm:$0xff]  }
  0x54   :  { %876 = vmatprep.subr.bf16.mxu0 %v1554_v4  ;;  %v121_v17 = vunpack.c.0.s8 %v120_v12  ;;  %830 = vmatpush1.bf16.msra.mxu1 %v1595_v19  ;;  %v1599_v22 = vld [vmem:[#allocation5 + $0x14] ss:$8 sps:$4 sm:$0xff]   ;;  %v1571_v25 = vld [vmem:[#allocation5 + $0x170] ss:$8 sps:$4 sm:$0xff]   ;;  %v1572_v30 = vld [vmem:[#allocation5 + $0x184] ss:$8 sps:$4 sm:$0xff]  }
  0x55   :  { %831 = vmatprep.subr.bf16.mxu1 %v1599_v22  ;;  %v1602_v26 = vld [vmem:[#allocation2 + $0x4] ss:$12 sps:$4 sm:$0xff]   ;;  %v1604_v27 = vld [vmem:[#allocation2 + $0x1c] ss:$12 sps:$4 sm:$0xff]   ;;  %v1606_v28 = vld [vmem:[#allocation2 + $0x34] ss:$12 sps:$4 sm:$0xff]  }
  0x56   :  { %v1958_v24 = vsub.s32 %v121_v17, %v1955_v18  ;;  %v1608_v29 = vld [vmem:[#allocation2 + $0x4c] ss:$12 sps:$4 sm:$0xff]   ;;  %v1615_v36 = vld [vmem:[#allocation5 + $0x20] ss:$8 sps:$4 sm:$0xff]   ;;  %v1575_v38 = vld [vmem:[#allocation5 + $0x194] ss:$8 sps:$4 sm:$0xff]  }
  0x57   :  { %877 = vmatpush1.bf16.msra.mxu0 %v1556_v5  ;;  %v1613_v35 = vld [vmem:[#allocation5 + $0x24] ss:$8 sps:$4 sm:$0xff]   ;;  %v1574_v37 = vld [vmem:[#allocation5 + $0x180] ss:$8 sps:$4 sm:$0xff]   ;;  %v1619_v41 = vld [vmem:[#allocation5 + $0x34] ss:$8 sps:$4 sm:$0xff]  }
  0x58   :  { %878 = vmatprep.subr.bf16.mxu0 %v1557_v6  ;;  %832 = vmatpush1.bf16.msra.mxu1 %v1601_v23  ;;  %v1961_v31 = vrot.slane %v1602_v26, %v1958_v24  ;;  %v1964_v32 = vrot.slane %v1604_v27, %v1958_v24  ;;  %v1967_v33 = vrot.slane %v1606_v28, %v1958_v24  ;;  %v1621_v43 = vld [vmem:[#allocation5 + $0x30] ss:$8 sps:$4 sm:$0xff]   ;;  %v1625_v45 = vld [vmem:[#allocation5 + $0x44] ss:$8 sps:$4 sm:$0xff]   ;;  %v1627_v47 = vld [vmem:[#allocation5 + $0x40] ss:$8 sps:$4 sm:$0xff]  }
  0x59   :  { %v1970_v34 = vrot.slane %v1608_v29, %v1958_v24  ;;  %833 = vmatprep.subr.bf16.mxu1 %v1613_v35  ;;  %v1577_v44 = vld [vmem:[#allocation5 + $0x190] ss:$8 sps:$4 sm:$0xff]   ;;  %v1578_v46 = vld [vmem:[#allocation5 + $0x1a4] ss:$8 sps:$4 sm:$0xff]   ;;  %v1631_v48 = vld [vmem:[#allocation5 + $0x54] ss:$8 sps:$4 sm:$0xff]  }
  0x5a   :  { %v150_v39 = vcombine.high %v1961_v31, %v1964_v32  ;;  %v1580_v49 = vld [vmem:[#allocation5 + $0x1a0] ss:$8 sps:$4 sm:$0xff]   ;;  %v1581_v50 = vld [vmem:[#allocation5 + $0x1b4] ss:$8 sps:$4 sm:$0xff]   ;;  %v1633_v51 = vld [vmem:[#allocation5 + $0x50] ss:$8 sps:$4 sm:$0xff]   ;;  %v149_v4 = vcombine.low %v1961_v31, %v1964_v32 }
  0x5b   :  { %879 = vmatpush1.bf16.msra.mxu0 %v1559_v7  ;;  %v204_v40 = vcombine.high %v1967_v33, %v1970_v34  ;;  %v1637_v52 = vld [vmem:[#allocation5 + $0x64] ss:$8 sps:$4 sm:$0xff]   ;;  %v1583_v53 = vld [vmem:[#allocation5 + $0x1b0] ss:$8 sps:$4 sm:$0xff]   ;;  %v1639_v55 = vld [vmem:[#allocation5 + $0x60] ss:$8 sps:$4 sm:$0xff]   ;;  %v203_v5 = vcombine.low %v1967_v33, %v1970_v34 }
  0x5c   :  { %880 = vmatprep.subr.bf16.mxu0 %v1560_v8  ;;  %834 = vmatpush1.bf16.msra.mxu1 %v1615_v36  ;;  %v1584_v54 = vld [vmem:[#allocation5 + $0x1c4] ss:$8 sps:$4 sm:$0xff]   ;;  %v1643_v56 = vld [vmem:[#allocation5 + $0x74] ss:$8 sps:$4 sm:$0xff]   ;;  %v1586_v57 = vld [vmem:[#allocation5 + $0x1c0] ss:$8 sps:$4 sm:$0xff]  }
  0x5d   :  { %v238_v42 = vpack.c.bf16 %v204_v40, %v150_v39  ;;  %835 = vmatprep.subr.bf16.mxu1 %v1619_v41  ;;  %v1587_v58 = vld [vmem:[#allocation5 + $0x1d4] ss:$8 sps:$4 sm:$0xff]   ;;  %v1645_v59 = vld [vmem:[#allocation5 + $0x70] ss:$8 sps:$4 sm:$0xff]   ;;  %v1649_v60 = vld [vmem:[#allocation5 + $0x84] ss:$8 sps:$4 sm:$0xff]  }
  0x5e   :  { %v1589_v61 = vld [vmem:[#allocation5 + $0x1d0] ss:$8 sps:$4 sm:$0xff]   ;;  %v1590_v62 = vld [vmem:[#allocation5 + $0x1e4] ss:$8 sps:$4 sm:$0xff]   ;;  %v1651_v63 = vld [vmem:[#allocation5 + $0x80] ss:$8 sps:$4 sm:$0xff]  }
  0x5f   :  { %881 = vmatpush1.bf16.msra.mxu0 %v1562_v9  ;;  %904 = vmatprep.mubr.bf16.mxu0 %v238_v42  ;;  %v1655_v0 = vld [vmem:[#allocation5 + $0x94] ss:$8 sps:$4 sm:$0xff]   ;;  %v1592_v1 = vld [vmem:[#allocation5 + $0x1e0] ss:$8 sps:$4 sm:$0xff]   ;;  %v1657_v3 = vld [vmem:[#allocation5 + $0x90] ss:$8 sps:$4 sm:$0xff]  }
  0x60   :  { %882 = vmatprep.subr.bf16.mxu0 %v1563_v10  ;;  %836 = vmatpush1.bf16.msra.mxu1 %v1621_v43  ;;  %v1596_v2 = vld [vmem:[#allocation5 + $0x1f4] ss:$8 sps:$4 sm:$0xff]   ;;  %v1661_v6 = vld [vmem:[#allocation5 + $0xa4] ss:$8 sps:$4 sm:$0xff]   ;;  %v1598_v7 = vld [vmem:[#allocation5 + $0x1f0] ss:$8 sps:$4 sm:$0xff]   ;;  %v237_v10 = vpack.c.bf16 %v203_v5, %v149_v4 }
  0x61   :  { %837 = vmatprep.subr.bf16.mxu1 %v1625_v45  ;;  %v1612_v8 = vld [vmem:[#allocation5 + $0x204] ss:$8 sps:$4 sm:$0xff]   ;;  %v1663_v9 = vld [vmem:[#allocation5 + $0xa0] ss:$8 sps:$4 sm:$0xff]   ;;  %v1667_v11 = vld [vmem:[#allocation5 + $0xb4] ss:$8 sps:$4 sm:$0xff]  }
  0x62   :  { %v1610_v12 = vld [vmem:[#allocation5 + $0x200] ss:$8 sps:$4 sm:$0xff]   ;;  %v1618_v13 = vld [vmem:[#allocation5 + $0x214] ss:$8 sps:$4 sm:$0xff]   ;;  %v1624_v16 = vld [vmem:[#allocation5 + $0x224] ss:$8 sps:$4 sm:$0xff]  }
  0x63   :  { %883 = vmatpush1.bf16.msra.mxu0 %v1565_v14  ;;  %v1616_v14 = vld [vmem:[#allocation5 + $0x210] ss:$8 sps:$4 sm:$0xff]   ;;  %v1673_v17 = vld [vmem:[#allocation5 + $0xc4] ss:$8 sps:$4 sm:$0xff]   ;;  %v1700_v22 = vld [vmem:[#allocation2 + $0x48] ss:$12 sps:$4 sm:$0xff]  }
  0x64   :  { %884 = vmatprep.subr.bf16.mxu0 %v1566_v15  ;;  %838 = vmatpush1.bf16.msra.mxu1 %v1627_v47  ;;  %v1669_v15 = vld [vmem:[#allocation5 + $0xb0] ss:$8 sps:$4 sm:$0xff]   ;;  %v1697_v19 = vld [vmem:[#allocation2] ss:$12 sps:$4 sm:$0xff]   ;;  %v1679_v27 = vld [vmem:[#allocation5 + $0xd4] ss:$8 sps:$4 sm:$0xff]  }
  0x65   :  { %839 = vmatprep.subr.bf16.mxu1 %v1631_v48  ;;  %v1675_v23 = vld [vmem:[#allocation5 + $0xc0] ss:$8 sps:$4 sm:$0xff]   ;;  %v1630_v31 = vld [vmem:[#allocation5 + $0x234] ss:$8 sps:$4 sm:$0xff]   ;;  %v1681_v32 = vld [vmem:[#allocation5 + $0xd0] ss:$8 sps:$4 sm:$0xff]  }
  0x66   :  { %v1622_v26 = vld [vmem:[#allocation5 + $0x220] ss:$8 sps:$4 sm:$0xff]   ;;  %v1707_v39 = vld [vmem:[#allocation2 + $0x50] ss:$12 sps:$4 sm:$0xff]   ;;  %v1685_v40 = vld [vmem:[#allocation5 + $0xe4] ss:$8 sps:$4 sm:$0xff]  }
  0x67   :  { %885 = vmatpush1.bf16.msra.mxu0 %v1568_v20  ;;  %v1698_v20 = vld [vmem:[#allocation2 + $0x18] ss:$12 sps:$4 sm:$0xff]   ;;  %v1704_v35 = vld [vmem:[#allocation2 + $0x8] ss:$12 sps:$4 sm:$0xff]   ;;  %v1705_v36 = vld [vmem:[#allocation2 + $0x20] ss:$12 sps:$4 sm:$0xff]   ;;  %v1994_v45 = vrot.slane %v1707_v39, %v1958_v24 }
  0x68   :  { %886 = vmatprep.subr.bf16.mxu0 %v1569_v21  ;;  %840 = vmatpush1.bf16.msra.mxu1 %v1633_v51  ;;  %v1699_v21 = vld [vmem:[#allocation2 + $0x30] ss:$12 sps:$4 sm:$0xff]   ;;  %v139_v28 = vrot.slane %v1698_v20, %v1958_v24  ;;  %v1985_v41 = vrot.slane %v1704_v35, %v1958_v24  ;;  %v1988_v42 = vrot.slane %v1705_v36, %v1958_v24  ;;  %v1687_v48 = vld [vmem:[#allocation5 + $0xe0] ss:$8 sps:$4 sm:$0xff]   ;;  %v1861_v35 = vmov 0.0  }
  0x69   :  { %841 = vmatprep.subr.bf16.mxu1 %v1637_v52  ;;  %v179_v29 = vrot.slane %v1699_v21, %v1958_v24  ;;  %v1634_v51 = vld [vmem:[#allocation5 + $0x240] ss:$8 sps:$4 sm:$0xff]   ;;  %v1713_v4 = vld [vmem:[#allocation7 + $0x10] sm:$0xff]   ;;  %v1714_v5 = vld [vmem:[#allocation7 + $0x58] sm:$0xff]  }
  0x6a   :  { %v168_v47 = vcombine.high %v1985_v41, %v1988_v42  ;;  %v1694_v20 = vld [vmem:[#allocation5 + $0x2e0] ss:$8 sps:$4 sm:$0xff]   ;;  %v1703_v21 = vld [vmem:[#allocation5 + $0x2f4] ss:$8 sps:$4 sm:$0xff]  }
  0x6b   :  { %887 = vmatpush1.bf16.msra.mxu0 %v1571_v25  ;;  %v125_v25 = vrot.slane %v1697_v19, %v1958_v24  ;;  %v1696_v19 = vld [vmem:[#allocation5 + $0x2e4] ss:$8 sps:$4 sm:$0xff]  }
  0x6c   :  { %888 = vmatprep.subr.bf16.mxu0 %v1572_v30  ;;  %842 = vmatpush1.bf16.msra.mxu1 %v1639_v55  ;;  %v193_v30 = vrot.slane %v1700_v22, %v1958_v24  ;;  %v1640_v55 = vld [vmem:[#allocation5 + $0x250] ss:$8 sps:$4 sm:$0xff]   ;;  %v167_v22 = vcombine.low %v1985_v41, %v1988_v42  ;;  %v337_v41 = vld [vmem:[%s2030_s2] sm:$0x3]  ;;  %v345_v42 = vsub.s32 1, %v1955_v18 }
  0x6d   :  { %843 = vmatprep.subr.bf16.mxu1 %v1643_v56  ;;  %v148_v33 = vcombine.high %v125_v25, %v139_v28  ;;  %v1693_v56 = vld [vmem:[#allocation5 + $0xf0] ss:$8 sps:$4 sm:$0xff]  }
  0x6e   :  { %v202_v34 = vcombine.high %v179_v29, %v193_v30 }
  0x6f   :  { %889 = vmatpush1.bf16.msra.mxu0 %v1574_v37  ;;  %v1706_v37 = vld [vmem:[#allocation2 + $0x38] ss:$12 sps:$4 sm:$0xff]  }
  0x70   :  { %890 = vmatprep.subr.bf16.mxu0 %v1575_v38  ;;  %844 = vmatpush1.bf16.msra.mxu1 %v1645_v59  ;;  %v236_v38 = vpack.c.bf16 %v202_v34, %v148_v33  ;;  %v1991_v43 = vrot.slane %v1706_v37, %v1958_v24  ;;  %v201_v24 = vcombine.low %v179_v29, %v193_v30  ;;  %v1709_v59 = vld [vmem:[#allocation7] sm:$0xff]   ;;  %v1718_v29 = vld [vmem:[#allocation7 + $0x68] sm:$0xff]   ;;  %v1722_v33 = vld [vmem:[#allocation7 + $0x78] sm:$0xff]  }
  0x71   :  { %845 = vmatprep.subr.bf16.mxu1 %v1649_v60  ;;  %v1719_v30 = vld [vmem:[#allocation7 + $0x28] sm:$0xff]   ;;  %v1723_v34 = vld [vmem:[#allocation7 + $0x38] sm:$0xff]  }
  0x72   :  { %861 = vmatprep.mubr.bf16.mxu1 %v236_v38 }
  0x73   :  { %891 = vmatpush1.bf16.msra.mxu0 %v1577_v44  ;;  %v1628_v44 = vld [vmem:[#allocation5 + $0x230] ss:$8 sps:$4 sm:$0xff]  }
  0x74   :  { %892 = vmatprep.subr.bf16.mxu0 %v1578_v46  ;;  %846 = vmatpush1.bf16.msra.mxu1 %v1651_v63  ;;  %v1636_v46 = vld [vmem:[#allocation5 + $0x244] ss:$8 sps:$4 sm:$0xff]   ;;  %v1654_v63 = vld [vmem:[#allocation5 + $0x274] ss:$8 sps:$4 sm:$0xff]  }
  0x75   :  { %847 = vmatprep.subr.bf16.mxu1 %v1655_v0  ;;  %v1711_v0 = vld [vmem:[#allocation7 + $0x8] sm:$0xff]  }
  0x77   :  { %893 = vmatpush1.bf16.msra.mxu0 %v1580_v49  ;;  %v222_v49 = vcombine.high %v1991_v43, %v1994_v45 }
  0x78   :  { %894 = vmatprep.subr.bf16.mxu0 %v1581_v50  ;;  %848 = vmatpush1.bf16.msra.mxu1 %v1657_v3  ;;  %v1691_v50 = vld [vmem:[#allocation5 + $0xf4] ss:$8 sps:$4 sm:$0xff]   ;;  %v1660_v3 = vld [vmem:[#allocation5 + $0x284] ss:$8 sps:$4 sm:$0xff]  }
  0x79   :  { %849 = vmatprep.subr.bf16.mxu1 %v1661_v6  ;;  %v240_v52 = vpack.c.bf16 %v222_v49, %v168_v47  ;;  %v1658_v6 = vld [vmem:[#allocation5 + $0x280] ss:$8 sps:$4 sm:$0xff]  }
  0x7b   :  { %895 = vmatpush1.bf16.msra.mxu0 %v1583_v53  ;;  %v1642_v53 = vld [vmem:[#allocation5 + $0x254] ss:$8 sps:$4 sm:$0xff]  }
  0x7c   :  { %896 = vmatprep.subr.bf16.mxu0 %v1584_v54  ;;  %850 = vmatpush1.bf16.msra.mxu1 %v1663_v9  ;;  %v147_v54 = vcombine.low %v125_v25, %v139_v28  ;;  %v1664_v9 = vld [vmem:[#allocation5 + $0x290] ss:$8 sps:$4 sm:$0xff]   ;;  %v1717_v28 = vld [vmem:[#allocation7 + $0x20] sm:$0xff]  }
  0x7d   :  { %851 = vmatprep.subr.bf16.mxu1 %v1667_v11  ;;  %v1670_v11 = vld [vmem:[#allocation5 + $0x2a0] ss:$8 sps:$4 sm:$0xff]   ;;  %v1701_v25 = vld [vmem:[#allocation5 + $0x2f0] ss:$8 sps:$4 sm:$0xff]  }
  0x7e   :  { %v235_v60 = vpack.c.bf16 %v201_v24, %v147_v54 }
  0x7f   :  { %897 = vmatpush1.bf16.msra.mxu0 %v1586_v57  ;;  %v1708_v57 = vld [vmem:[#allocation7 + $0x40] sm:$0xff]  }
  0x80   :  { %898 = vmatprep.subr.bf16.mxu0 %v1587_v58  ;;  %852 = vmatpush1.bf16.msra.mxu1 %v1669_v15  ;;  %v1648_v58 = vld [vmem:[#allocation5 + $0x264] ss:$8 sps:$4 sm:$0xff]   ;;  %v1682_v15 = vld [vmem:[#allocation5 + $0x2c0] ss:$8 sps:$4 sm:$0xff]  }
  0x81   :  { %853 = vmatprep.subr.bf16.mxu1 %v1673_v17  ;;  %v1688_v17 = vld [vmem:[#allocation5 + $0x2d0] ss:$8 sps:$4 sm:$0xff]  }
  0x83   :  { %899 = vmatpush1.bf16.msra.mxu0 %v1589_v61  ;;  %v1710_v61 = vld [vmem:[#allocation7 + $0x48] sm:$0xff]  }
  0x84   :  { %900 = vmatprep.subr.bf16.mxu0 %v1590_v62  ;;  %854 = vmatpush1.bf16.msra.mxu1 %v1675_v23  ;;  %v1646_v62 = vld [vmem:[#allocation5 + $0x260] ss:$8 sps:$4 sm:$0xff]   ;;  %v221_v23 = vcombine.low %v1991_v43, %v1994_v45 }
  0x85   :  { %855 = vmatprep.subr.bf16.mxu1 %v1679_v27  ;;  %v1716_v27 = vld [vmem:[#allocation7 + $0x60] sm:$0xff]  }
  0x87   :  { %901 = vmatpush1.bf16.msra.mxu0 %v1592_v1  ;;  %v1712_v1 = vld [vmem:[#allocation7 + $0x50] sm:$0xff]  }
  0x88   :  { %902 = vmatprep.subr.bf16.mxu0 %v1596_v2  ;;  %856 = vmatpush1.bf16.msra.mxu1 %v1681_v32  ;;  %v1652_v2 = vld [vmem:[#allocation5 + $0x270] ss:$8 sps:$4 sm:$0xff]  }
  0x89   :  { %857 = vmatprep.subr.bf16.mxu1 %v1685_v40  ;;  %v1721_v32 = vld [vmem:[#allocation7 + $0x30] sm:$0xff]   ;;  %v341_v40 = vsub.s32 0, %v1955_v18 }
  0x8b   :  { %903 = vmatpush1.bf16.msra.mxu0 %v1598_v7  ;;  %v1666_v7 = vld [vmem:[#allocation5 + $0x294] ss:$8 sps:$4 sm:$0xff]   ;;  %v342_v43 = vrot.slane %v337_v41, %v341_v40 }
  0x8c   :  { %915 = vmatprep.subr.bf16.mxu0 %v1612_v8  ;;  %858 = vmatpush1.bf16.msra.mxu1 %v1687_v48  ;;  %v1715_v8 = vld [vmem:[#allocation7 + $0x18] sm:$0xff]  }
  0x8d   :  { %859 = vmatprep.subr.bf16.mxu1 %v1691_v50 }
  0x8e   :  { %905 = vmatmul.mubr.bf16.vlgmr.msra.gmra.mrb[0].mxu0 %v237_v10  ;;  %v1672_v10 = vld [vmem:[#allocation5 + $0x2a4] ss:$8 sps:$4 sm:$0xff]  }
  0x8f   :  { %916 = vmatpush1.bf16.msra.mxu0 %v1610_v12  ;;  %947 = vmatprep.mubr.bf16.mxu0 %v240_v52  ;;  %v1678_v12 = vld [vmem:[#allocation5 + $0x2b4] ss:$8 sps:$4 sm:$0xff]  }
  0x90   :  { %917 = vmatprep.subr.bf16.mxu0 %v1618_v13  ;;  %860 = vmatpush1.bf16.msra.mxu1 %v1693_v56  ;;  %v1676_v13 = vld [vmem:[#allocation5 + $0x2b0] ss:$8 sps:$4 sm:$0xff]  }
  0x91   :  { %1468 = vmatprep.subr.bf16.mxu1 %v1708_v57 }
  0x93   :  { %918 = vmatpush1.bf16.msra.mxu0 %v1616_v14  ;;  %862 = vmatmul.mubr.bf16.vlgmr.msra.gmra.mrb[0].mxu1 %v235_v60  ;;  %v1684_v14 = vld [vmem:[#allocation5 + $0x2c4] ss:$8 sps:$4 sm:$0xff]  }
  0x94   :  { %919 = vmatprep.subr.bf16.mxu0 %v1624_v16  ;;  %1469 = vmatpush3.bf16.msra.mxu1 %v1709_v59  ;;  %v1690_v16 = vld [vmem:[#allocation5 + $0x2d4] ss:$8 sps:$4 sm:$0xff]  }
  0x95   :  { %1470 = vmatprep.subr.bf16.mxu1 %v1710_v61 }
  0x97   :  { %920 = vmatpush1.bf16.msra.mxu0 %v1622_v26  ;;  %v239_v26 = vpack.c.bf16 %v221_v23, %v167_v22  ;;  %v1454_v22 = vld [vmem:[%s2034_s6] ss:$0 sm:$0xff] }
  0x98   :  { %921 = vmatprep.subr.bf16.mxu0 %v1630_v31  ;;  %1471 = vmatpush3.bf16.msra.mxu1 %v1711_v0  ;;  %v1720_v31 = vld [vmem:[#allocation7 + $0x70] sm:$0xff]  }
  0x99   :  { %1472 = vmatprep.subr.bf16.mxu1 %v1712_v1  ;;  %v1726_v0 = vld [vmem:[#allocation8 + $0x10] sm:$0xff]   ;;  %v1727_v1 = vld [vmem:[#allocation8 + $0x18] sm:$0xff]  }
  0x9b   :  { %922 = vmatpush1.bf16.msra.mxu0 %v1628_v44  ;;  %v346_v44 = vrot.slane %v337_v41, %v345_v42 }
  0x9c   :  { %923 = vmatprep.subr.bf16.mxu0 %v1636_v46  ;;  %1473 = vmatpush3.bf16.msra.mxu1 %v1713_v4  ;;  %v1730_v4 = vld [vmem:[#allocation8 + $0x30] sm:$0xff]  }
  0x9d   :  { %1474 = vmatprep.subr.bf16.mxu1 %v1714_v5  ;;  %v1731_v5 = vld [vmem:[#allocation8 + $0x38] sm:$0xff]  }
  0x9f   :  { %924 = vmatpush1.bf16.msra.mxu0 %v1634_v51 }
  0xa0   :  { %925 = vmatprep.subr.bf16.mxu0 %v1642_v53  ;;  %1475 = vmatpush3.bf16.msra.mxu1 %v1715_v8 }
  0xa1   :  { %1476 = vmatprep.subr.bf16.mxu1 %v1716_v27 }
  0xa3   :  { %926 = vmatpush1.bf16.msra.mxu0 %v1640_v55 }
  0xa4   :  { %927 = vmatprep.subr.bf16.mxu0 %v1648_v58  ;;  %1477 = vmatpush3.bf16.msra.mxu1 %v1717_v28 }
  0xa5   :  { %1478 = vmatprep.subr.bf16.mxu1 %v1718_v29 }
  0xa7   :  { %928 = vmatpush1.bf16.msra.mxu0 %v1646_v62  ;;  %v1724_v62 = vld [vmem:[#allocation8] sm:$0xff]  }
  0xa8   :  { %929 = vmatprep.subr.bf16.mxu0 %v1654_v63  ;;  %1479 = vmatpush3.bf16.msra.mxu1 %v1719_v30  ;;  %v1725_v63 = vld [vmem:[#allocation8 + $0x8] sm:$0xff]  }
  0xa9   :  { %1480 = vmatprep.subr.bf16.mxu1 %v1720_v31 }
  0xab   :  { %930 = vmatpush1.bf16.msra.mxu0 %v1652_v2  ;;  %v1728_v2 = vld [vmem:[#allocation8 + $0x20] sm:$0xff]  }
  0xac   :  { %931 = vmatprep.subr.bf16.mxu0 %v1660_v3  ;;  %1481 = vmatpush3.bf16.msra.mxu1 %v1721_v32  ;;  %v1729_v3 = vld [vmem:[#allocation8 + $0x28] sm:$0xff]  }
  0xad   :  { %1482 = vmatprep.subr.bf16.mxu1 %v1722_v33 }
  0xaf   :  { %932 = vmatpush1.bf16.msra.mxu0 %v1658_v6 }
  0xb0   :  { %933 = vmatprep.subr.bf16.mxu0 %v1666_v7  ;;  %1483 = vmatpush3.bf16.msra.mxu1 %v1723_v34  ;;  %v1437_v7 = vld [vmem:[%s2032_s4] ss:$0 sm:$0xff] }
  0xb1   :  { %1499 = vmatprep.subr.bf16.mxu1 %v1861_v35 }
  0xb3   :  { %934 = vmatpush1.bf16.msra.mxu0 %v1664_v9 }
  0xb4   :  { %935 = vmatprep.subr.bf16.mxu0 %v1672_v10 }
  0xb7   :  { %936 = vmatpush1.bf16.msra.mxu0 %v1670_v11 }
  0xb8   :  { %937 = vmatprep.subr.bf16.mxu0 %v1678_v12 }
  0xbb   :  { %938 = vmatpush1.bf16.msra.mxu0 %v1676_v13 }
  0xbc   :  { %939 = vmatprep.subr.bf16.mxu0 %v1684_v14 }
  0xbf   :  { %940 = vmatpush1.bf16.msra.mxu0 %v1682_v15 }
  0xc0   :  { %941 = vmatprep.subr.bf16.mxu0 %v1690_v16 }
  0xc3   :  { %942 = vmatpush1.bf16.msra.mxu0 %v1688_v17 }
  0xc4   :  { %943 = vmatprep.subr.bf16.mxu0 %v1696_v19  ;;  %v1863_v19 = vmov 1966171168  }
  0xc7   :  { %944 = vmatpush1.bf16.msra.mxu0 %v1694_v20  ;;  %v1259_v20 = vunpack.c.l.s4 %v1863_v19 }
  0xc8   :  { %945 = vmatprep.subr.bf16.mxu0 %v1703_v21 }
  0xc9   :  { %v1260_v21 = vunpack.c.0.s8 %v1259_v20 }
  0xcb   :  { %946 = vmatpush1.bf16.msra.mxu0 %v1701_v25  ;;  %v1263_v29 = vsub.s32 %v1260_v21, %v1955_v18 }
  0xce   :  { %948 = vmatmul.mubr.bf16.vlgmr.msra.gmra.mrb[0].mxu0 %v239_v26 }
 0x166   :  { %v863_v36 = vpop.f32.mrb[0].mxu1 }
 0x167   :  { %v865_v37 = vpop.f32.mrb[1].mxu1  ;;  %v864_v45 = vadd.f32 %v863_v36, %v342_v43 }
 0x168   :  { %v867_v38 = vpop.f32.mrb[2].mxu1  ;;  %v866_v46 = vadd.f32 %v865_v37, %v346_v44 }
 0x169   :  { %v869_v39 = vpop.f32.mrb[3].mxu1  ;;  %v868_v48 = vadd.f32 %v867_v38, %v342_v43 }
 0x16a   :  { %v870_v51 = vadd.f32 %v869_v39, %v346_v44 }
 0x1a1   :  { %v949_v47 = vpop.f32.mrb[0].mxu0 }
 0x1a2   :  { %v1520_v49 = vadd.f32 %v949_v47, %v864_v45  ;;  %v951_v50 = vpop.f32.mrb[1].mxu0 }
 0x1a3   :  { %v1522_v52 = vadd.f32 %v951_v50, %v866_v46  ;;  %v953_v53 = vpop.f32.mrb[2].mxu0 }
 0x1a4   :  { %v1524_v54 = vadd.f32 %v953_v53, %v868_v48  ;;  %v955_v24 = vpop.f32.mrb[3].mxu0  ;;  %v958_v56 = vmax.f32 %v1520_v49, 0.0 }
 0x1a5   :  { %v1526_v55 = vadd.f32 %v955_v24, %v870_v51  ;;  %v959_v58 = vmax.f32 %v1522_v52, 0.0 }
 0x1a6   :  { %v960_v57 = vmax.f32 %v1524_v54, 0.0 }
 0x1a7   :  { %v961_v59 = vmax.f32 %v1526_v55, 0.0 }
 0x1a8   :  { %v962_v60 = vpack.c.bf16 %v960_v57, %v958_v56 }
 0x1a9   :  { %v963_v61 = vpack.c.bf16 %v961_v59, %v959_v58 }
 0x1ab   :  { %1131 = vmatprep.mubr.bf16.mxu1 %v963_v61 }
 0x1ac   :  { %1132 = vmatmul.mubr.bf16.vlgmr.msra.gmra.mrb[4].mxu1 %v962_v60 }
 0x1ad   :  { %1500 = vmatpush3.bf16.msra.mxu1 %v1724_v62  ;;  %1515 = vmatprep.mubr.msk.bf16.mxu1 %vm1862_vm0, %v1861_v35 }
 0x1ae   :  { %1501 = vmatprep.subr.bf16.mxu1 %v1861_v35 }
 0x1b1   :  { %1502 = vmatpush3.bf16.msra.mxu1 %v1725_v63 }
 0x1b2   :  { %1503 = vmatprep.subr.bf16.mxu1 %v1861_v35 }
 0x1b5   :  { %1504 = vmatpush3.bf16.msra.mxu1 %v1726_v0 }
 0x1b6   :  { %1505 = vmatprep.subr.bf16.mxu1 %v1861_v35 }
 0x1b9   :  { %1506 = vmatpush3.bf16.msra.mxu1 %v1727_v1 }
 0x1ba   :  { %1507 = vmatprep.subr.bf16.mxu1 %v1861_v35 }
 0x1bd   :  { %1508 = vmatpush3.bf16.msra.mxu1 %v1728_v2 }
 0x1be   :  { %1509 = vmatprep.subr.bf16.mxu1 %v1861_v35 }
 0x1c1   :  { %1510 = vmatpush3.bf16.msra.mxu1 %v1729_v3 }
 0x1c2   :  { %1511 = vmatprep.subr.bf16.mxu1 %v1861_v35 }
 0x1c5   :  { %1512 = vmatpush3.bf16.msra.mxu1 %v1730_v4 }
 0x1c6   :  { %1513 = vmatprep.subr.bf16.mxu1 %v1861_v35 }
 0x1c9   :  { %1514 = vmatpush3.bf16.msra.mxu1 %v1731_v5 }
 0x27f   :  { %v1484_v6 = vpop.f32.mrb[4].mxu1 }
 0x280   :  { %v1485_v8 = vpop.f32.mrb[5].mxu1 }
 0x281   :  { %v1486_v9 = vadd.f32 %v1485_v8, %v1484_v6  ;;  %v1487_v10 = vpop.f32.mrb[6].mxu1 }
 0x282   :  { %v1488_v11 = vpop.f32.mrb[7].mxu1 }
 0x283   :  { %v1134_v12 = vadd.f32 %v1486_v9, %v1437_v7  ;;  %v1489_v13 = vadd.f32 %v1488_v11, %v1487_v10 }
 0x285   :  { %v1137_v14 = vadd.f32 %v1489_v13, %v1437_v7  ;;  %v1140_v15 = vmax.f32 %v1134_v12, 0.0 }
 0x287   :  { %v1141_v16 = vmax.f32 %v1137_v14, 0.0 }
 0x289   :  { %v1142_v17 = vpack.c.bf16 %v1141_v16, %v1140_v15 }
 0x28b   :  { %1516 = vmatmul.mubr.bf16.vlgmr.msra.gmra.mrb[8].mxu1 %v1142_v17 }
 0x35e   :  { %v1248_v23 = vpop.f32.mrb[8].mxu1 }
 0x35f   :  { %v1517_v25 = vpop.f32.mrb[9].mxu1  ;;  %v1249_v27 = vadd.f32 %v1454_v22, %v1248_v23 }
 0x360   :  { %v1251_v26 = vpop.f32.mrb[10].mxu1 }
 0x361   :  { %v1252_v28 = vadd.f32 %v1454_v22, %v1251_v26  ;;  %v1518_v30 = vpop.f32.mrb[11].mxu1 }
 0x363   :  { %v1255_v31 = vpack.c.bf16 %v1252_v28, %v1249_v27  ;;  %v1463_v32 = vpack.c.bf16 %v1252_v28, %v1252_v28 }
 0x365   :  { %v1264_v33 = vrot.slane %v1255_v31, %v1263_v29  ;;  %v1271_v34 = vrot.slane %v1463_v32, %v1263_v29 }
 0x367   :  { %v1272_v35 = vcombine.high %v1264_v33, %v1264_v33  ;;  %v1273_v36 = vcombine.high %v1271_v34, %v1271_v34  ;;  %v1280_v37 = vrot.slane %v1264_v33, %v1263_v29  ;;  %v1287_v38 = vrot.slane %v1271_v34, %v1263_v29  ;;  %1464 = vst.sshfl [vmem:[#allocation10] sm:$0x1 pattern:$0x73625140] %v1264_v33 }
 0x368   :  { %1466 = vst.sshfl [vmem:[#allocation10 + $0x4] sm:$0x1 pattern:$0x73625140] %v1271_v34 }
 0x369   :  { %v1294_v39 = vrot.slane %v1272_v35, %v1263_v29  ;;  %v1301_v40 = vrot.slane %v1273_v36, %v1263_v29  ;;  %v1302_v41 = vcombine.high %v1280_v37, %v1280_v37  ;;  %v1303_v42 = vcombine.high %v1287_v38, %v1287_v38  ;;  %1465 = vst.sshfl [vmem:[#allocation10 + $0x1] sm:$0x1 pattern:$0x73625140] %v1272_v35 }
 0x36a   :  { %1467 = vst.sshfl [vmem:[#allocation10 + $0x5] sm:$0x1 pattern:$0x73625140] %v1273_v36 }
 0x36b   :  { %v1304_v43 = vcombine.high %v1294_v39, %v1294_v39  ;;  %v1305_v44 = vcombine.high %v1301_v40, %v1301_v40  ;;  %1316 = vst [vmem:[#allocation10 + $0x2] sm:$0x1] %v1302_v41  ;;  %1320 = vst [vmem:[#allocation10 + $0x6] sm:$0x1] %v1303_v42 }
 0x36d   :  { %1317 = vst [vmem:[#allocation10 + $0x3] sm:$0x1] %v1304_v43  ;;  %1321 = vst [vmem:[#allocation10 + $0x7] sm:$0x1] %v1305_v44 }
 0x36e   :  { %1326 = vsyncadd [#allocation4], 112  ;;  %s1864_s4 = smov [#allocation10]  }
 0x36f   :  { %s1327_s6 = sshll.u32 %s1864_s4, 4  ;;  %s1328_s6 = int_to_ptr.vmem [resolvable:$true] %s1327_s6 }
 0x370   :  { %s1820_s10 = scalar_lea.vmem %s1328_s6, 16  ;;  %s1824_s11 = scalar_lea.vmem %s1328_s6, 128 }
 0x371   :  { %p1821_p4 = scmp.ne.s32.totalorder %s1328_s6, %s1820_s10  ;;  %p1825_p5 = scmp.lt.s32.totalorder %s1328_s6, %s1328_s6 }
 0x372   :  { %p1826_p6 = scmp.lt.s32.totalorder %s1824_s11, %s1820_s10 }
 0x374   :  { %p1827_p7 = por %p1826_p6, %p1825_p5 }
 0x376   :  { %p1828_p8 = pnand %p1827_p7, %p1821_p4 }
 0x378   :  { %1831 = shalt.err (!%p1828_p8)
}
 0x379   :  { %s1832_s14 = scalar_lea.hbm %s2035_s7, 16 }
 0x37a   :  { %p1833_p9 = scmp.ne.s32.totalorder %s2035_s7, %s1832_s14  ;;  %p1836_p10 = scmp.lt.u32.totalorder %s1832_s14, %s2035_s7 }
 0x37c   :  { %p1838_p11 = pnand %p1836_p10, %p1833_p9 }
 0x37e   :  { %1841 = shalt.err (!%p1838_p11)
}
 0x37f   :  { %s1865_s18 = smov 16   ;;  %s1866_s19 = smov 1  }
 0x380   :  { %1333 = dma.vmem_to_hbm [thread:$0]  %s1328_s6, 16, %s2035_s7, [#allocation4], %s1865_s18, %s1865_s18, %s1866_s19  }
 0x381   :  { %1848 = dma.done.wait [#allocation4], 128  }
 0x382   :  { %1849 = vsyncadd [#allocation4], 4294967168 }
 0x383   :  { %1337 = vsyncpa [#allocation3], 1 }
 0x384   :  { %1338 = vsyncpa [#allocation6], 1 }
 0x385   :  { %1339 = vsyncpa [#allocation9], 1 }
 0x386   :  { %1340 = vsyncpa [#allocation4], 1 }

</bundles_post_ra>
